<compile_context>
chip_gen: v6e
topology: v6e:2x2x1
jax: 0.10.0
libtpu: 0.0.40
codegen_flags: <defaults>
</compile_context>

<pallas_src>
import jax
import jax.numpy as jnp
from jax.experimental import pallas as pl
from jax.experimental.pallas import tpu as pltpu


def _lstm_kernel(x_ref, h0_ref, c0_ref, wih_ref, whh_ref, b_ref,
                 w1_ref, b1_ref, w2_ref, b2_ref,
                 rnn_out_ref, out_ref, xw_sc):
    """Whole forward pass in one invocation; sequential time loop in-kernel."""
    T, B, H = rnn_out_ref.shape

    # ---- prologue: everything not on the serial h->h chain -----------------
    whh = whh_ref[...]                               # (H, 4H), read once
    w1 = w1_ref[...]
    b1 = b1_ref[...]
    w2 = w2_ref[...]
    b2 = b2_ref[...]

    # Batched input projection for all timesteps + summed bias, computed once:
    #   xw[t*B + b, :] = x[b, t, :] @ W_ih^T + (b_ih + b_hh)
    xw_sc[...] = (
        jnp.dot(x_ref[...], wih_ref[...], preferred_element_type=jnp.float32)
        + b_ref[...])                                # (T*B, 4H)

    # ---- recurrence (latency-bound serial chain) ----------------------------
    def step(t, carry):
        h, c = carry
        xw_t = xw_sc[pl.ds(t * B, B), :]             # (B, 4H) contiguous rows
        gates = xw_t + jnp.dot(h, whh, preferred_element_type=jnp.float32)

        sig = jax.nn.sigmoid(gates)                  # one EUP pass for i, f, o
        tnh = jnp.tanh(gates)                        # one EUP pass for g
        i_g = sig[:, 0 * H:1 * H]
        f_g = sig[:, 1 * H:2 * H]
        g_g = tnh[:, 2 * H:3 * H]
        o_g = sig[:, 3 * H:4 * H]

        c_new = f_g * c + i_g * g_g
        h_new = o_g * jnp.tanh(c_new)

        rnn_out_ref[t] = jnp.tanh(h_new)             # module's tanh(rnn_out)
        return (h_new, c_new)

    h_fin, _ = jax.lax.fori_loop(0, T, step, (h0_ref[...], c0_ref[...]),
                                 unroll=True)

    # ---- FC head on the last timestep ---------------------------------------
    tanh_last = jnp.tanh(h_fin)                      # == rnn_out[:, -1, :]
    z1 = jnp.dot(tanh_last, w1, preferred_element_type=jnp.float32) + b1
    out_ref[...] = jnp.dot(z1, w2, preferred_element_type=jnp.float32) + b2


@jax.jit
def lstm_network_forward(x, hidden, params):
    """x: (B, T, I) float32; hidden = (h0, c0), each (1, B, H)."""
    B, T, I = x.shape
    h0, c0 = hidden
    H = params["weight_hh"].shape[1]
    O = params["fc2_w"].shape[0]

    # Pre-transpose weights so the kernel does plain row-major matmuls.
    wih_t = params["weight_ih"].T                              # (I, 4H)
    whh_t = params["weight_hh"].T                              # (H, 4H)
    b = (params["bias_ih"] + params["bias_hh"]).reshape(1, 4 * H)
    w1_t = params["fc1_w"].T                                   # (H, H)
    b1 = params["fc1_b"].reshape(1, H)
    w2_t = params["fc2_w"].T                                   # (H, O)
    b2 = params["fc2_b"].reshape(1, O)

    # Time-major flattening: row t*B + b  ==  x[b, t, :]   (tiny copy).
    x_flat = jnp.transpose(x, (1, 0, 2)).reshape(T * B, I)     # (T*B, I)
    h0_2d = h0[0]                                              # (B, H)
    c0_2d = c0[0]                                              # (B, H)

    vmem = pl.BlockSpec(memory_space=pltpu.MemorySpace.VMEM)

    rnn_out_tbh, out = pl.pallas_call(
        _lstm_kernel,
        out_shape=(jax.ShapeDtypeStruct((T, B, H), jnp.float32),
                   jax.ShapeDtypeStruct((B, O), jnp.float32)),
        in_specs=[vmem] * 10,
        out_specs=(vmem, vmem),
        scratch_shapes=[pltpu.VMEM((T * B, 4 * H), jnp.float32)],  # xw stage
    )(x_flat, h0_2d, c0_2d, wih_t, whh_t, b, w1_t, b1, w2_t, b2)

    rnn_out = jnp.transpose(rnn_out_tbh, (1, 0, 2))            # (B, T, H)
    return out, rnn_out


def _reference_forward(x, hidden, params):
    """Pure-JAX reference reproducing torch semantics (for verification)."""
    h0, c0 = hidden
    H = params["weight_hh"].shape[1]
    wih, whh = params["weight_ih"], params["weight_hh"]
    b = params["bias_ih"] + params["bias_hh"]

    def step(carry, x_t):
        h, c = carry
        gates = x_t @ wih.T + h @ whh.T + b
        i = jax.nn.sigmoid(gates[:, 0 * H:1 * H])
        f = jax.nn.sigmoid(gates[:, 1 * H:2 * H])
        g = jnp.tanh(gates[:, 2 * H:3 * H])
        o = jax.nn.sigmoid(gates[:, 3 * H:4 * H])
        c = f * c + i * g
        h = o * jnp.tanh(c)
        return (h, c), h

    (_, _), hs = jax.lax.scan(step, (h0[0], c0[0]), jnp.transpose(x, (1, 0, 2)))
    rnn_out = jnp.tanh(jnp.transpose(hs, (1, 0, 2)))           # (B, T, H)
    last = rnn_out[:, -1, :]
    out = (last @ params["fc1_w"].T + params["fc1_b"]) @ params["fc2_w"].T \
        + params["fc2_b"]
    return out, rnn_out


def _init_params(key, input_size, hidden, output_size):
    ks = jax.random.split(key, 8)
    s = 1.0 / jnp.sqrt(hidden)
    u = lambda k, shp: jax.random.uniform(k, shp, jnp.float32, -s, s)
    return {
        "weight_ih": u(ks[0], (4 * hidden, input_size)),
        "weight_hh": u(ks[1], (4 * hidden, hidden)),
        "bias_ih":   u(ks[2], (4 * hidden,)),
        "bias_hh":   u(ks[3], (4 * hidden,)),
        "fc1_w":     u(ks[4], (hidden, hidden)),
        "fc1_b":     u(ks[5], (hidden,)),
        "fc2_w":     u(ks[6], (output_size, hidden)),
        "fc2_b":     u(ks[7], (output_size,)),
    }


if __name__ == "__main__":
    B, T, I, H, O = 2, 8, 4, 32, 4
    key = jax.random.PRNGKey(0)
    k_x, k_p = jax.random.split(key)

    x = jax.random.normal(k_x, (B, T, I), jnp.float32)
    hidden = (jnp.zeros((1, B, H), jnp.float32),               # initHidden()
              jnp.zeros((1, B, H), jnp.float32))
    params = _init_params(k_p, I, H, O)

    out, rnn_out = lstm_network_forward(x, hidden, params)
    jax.block_until_ready((out, rnn_out))

    ref_out, ref_rnn = _reference_forward(x, hidden, params)
    assert jnp.allclose(out, ref_out, atol=1e-5, rtol=1e-5)
    assert jnp.allclose(rnn_out, ref_rnn, atol=1e-5, rtol=1e-5)

    print("KERNEL_OK")
</pallas_src>

<mosaic_0001>
module attributes {stable_mosaic.version = 11 : i64} {
  func.func @_lstm_kernel(%arg0: memref<16x4xf32, #tpu.memory_space<vmem>>, %arg1: memref<2x32xf32, #tpu.memory_space<vmem>>, %arg2: memref<2x32xf32, #tpu.memory_space<vmem>>, %arg3: memref<4x128xf32, #tpu.memory_space<vmem>>, %arg4: memref<32x128xf32, #tpu.memory_space<vmem>>, %arg5: memref<1x128xf32, #tpu.memory_space<vmem>>, %arg6: memref<32x32xf32, #tpu.memory_space<vmem>>, %arg7: memref<1x32xf32, #tpu.memory_space<vmem>>, %arg8: memref<32x4xf32, #tpu.memory_space<vmem>>, %arg9: memref<1x4xf32, #tpu.memory_space<vmem>>, %arg10: memref<8x2x32xf32, #tpu.memory_space<vmem>>, %arg11: memref<2x4xf32, #tpu.memory_space<vmem>>, %arg12: memref<16x128xf32, #tpu.memory_space<vmem>>) attributes {dimension_semantics = [], scalar_prefetch = 0 : i64, scratch_operands = 1 : i64, tpu.core_type = #tpu.core_type<tc>} {
    %c0 = arith.constant 0 : index
    %c0_0 = arith.constant 0 : index
    %0 = vector.load %arg4[%c0, %c0_0] : memref<32x128xf32, #tpu.memory_space<vmem>>, vector<32x128xf32>
    %c0_1 = arith.constant 0 : index
    %c0_2 = arith.constant 0 : index
    %1 = vector.load %arg6[%c0_1, %c0_2] : memref<32x32xf32, #tpu.memory_space<vmem>>, vector<32x32xf32>
    %c0_3 = arith.constant 0 : index
    %c0_4 = arith.constant 0 : index
    %2 = vector.load %arg7[%c0_3, %c0_4] : memref<1x32xf32, #tpu.memory_space<vmem>>, vector<1x32xf32>
    %c0_5 = arith.constant 0 : index
    %c0_6 = arith.constant 0 : index
    %3 = vector.load %arg8[%c0_5, %c0_6] : memref<32x4xf32, #tpu.memory_space<vmem>>, vector<32x4xf32>
    %c0_7 = arith.constant 0 : index
    %c0_8 = arith.constant 0 : index
    %4 = vector.load %arg9[%c0_7, %c0_8] : memref<1x4xf32, #tpu.memory_space<vmem>>, vector<1x4xf32>
    %c0_9 = arith.constant 0 : index
    %c0_10 = arith.constant 0 : index
    %5 = vector.load %arg0[%c0_9, %c0_10] : memref<16x4xf32, #tpu.memory_space<vmem>>, vector<16x4xf32>
    %c0_11 = arith.constant 0 : index
    %c0_12 = arith.constant 0 : index
    %6 = vector.load %arg3[%c0_11, %c0_12] : memref<4x128xf32, #tpu.memory_space<vmem>>, vector<4x128xf32>
    %cst = arith.constant dense<0.000000e+00> : vector<16x128xf32>
    %7 = tpu.matmul %5, %6, %cst {dimension_numbers = #tpu.dot_dimension_numbers<[1], [0], [0], [1], [0, 0, 1, 1], [], []>} : vector<16x4xf32>, vector<4x128xf32>, vector<16x128xf32> -> vector<16x128xf32>
    %c0_13 = arith.constant 0 : index
    %c0_14 = arith.constant 0 : index
    %8 = vector.load %arg5[%c0_13, %c0_14] : memref<1x128xf32, #tpu.memory_space<vmem>>, vector<1x128xf32>
    %9 = vector.broadcast %8 : vector<1x128xf32> to vector<16x128xf32>
    %10 = arith.addf %7, %9 : vector<16x128xf32>
    %c0_15 = arith.constant 0 : index
    %c0_16 = arith.constant 0 : index
    %11 = vector.load %arg12[%c0_15, %c0_16] : memref<16x128xf32, #tpu.memory_space<vmem>>, vector<16x128xf32>
    tpu.vector_store %arg12[%c0_15, %c0_16], %10 {strides = array<i32>} : memref<16x128xf32, #tpu.memory_space<vmem>>, vector<16x128xf32>,
    %c0_17 = arith.constant 0 : index
    %c0_18 = arith.constant 0 : index
    %12 = vector.load %arg1[%c0_17, %c0_18] : memref<2x32xf32, #tpu.memory_space<vmem>>, vector<2x32xf32>
    %c0_19 = arith.constant 0 : index
    %c0_20 = arith.constant 0 : index
    %13 = vector.load %arg2[%c0_19, %c0_20] : memref<2x32xf32, #tpu.memory_space<vmem>>, vector<2x32xf32>
    %c0_i32 = arith.constant 0 : i32
    %c2_i32 = arith.constant 2 : i32
    %14 = arith.muli %c0_i32, %c2_i32 : i32
    %15 = arith.index_cast %14 : i32 to index
    %c0_21 = arith.constant 0 : index
    %16 = vector.load %arg12[%15, %c0_21] : memref<16x128xf32, #tpu.memory_space<vmem>>, vector<2x128xf32>
    %cst_22 = arith.constant dense<0.000000e+00> : vector<2x128xf32>
    %17 = tpu.matmul %12, %0, %cst_22 {dimension_numbers = #tpu.dot_dimension_numbers<[1], [0], [0], [1], [0, 0, 1, 1], [], []>} : vector<2x32xf32>, vector<32x128xf32>, vector<2x128xf32> -> vector<2x128xf32>
    %18 = arith.addf %16, %17 : vector<2x128xf32>
    %19 = arith.negf %18 : vector<2x128xf32>
    %20 = math.exp %19 : vector<2x128xf32>
    %cst_23 = arith.constant 1.000000e+00 : f32
    %21 = vector.broadcast %cst_23 : f32 to vector<2x128xf32>
    %22 = arith.addf %21, %20 : vector<2x128xf32>
    %23 = arith.divf %21, %22 : vector<2x128xf32>
    %24 = math.tanh %18 : vector<2x128xf32>
    %25 = vector.extract_strided_slice %23 {offsets = [0, 0], sizes = [2, 32], strides = [1, 1]} : vector<2x128xf32> to vector<2x32xf32>
    %26 = vector.extract_strided_slice %23 {offsets = [0, 32], sizes = [2, 32], strides = [1, 1]} : vector<2x128xf32> to vector<2x32xf32>
    %27 = vector.extract_strided_slice %24 {offsets = [0, 64], sizes = [2, 32], strides = [1, 1]} : vector<2x128xf32> to vector<2x32xf32>
    %28 = vector.extract_strided_slice %23 {offsets = [0, 96], sizes = [2, 32], strides = [1, 1]} : vector<2x128xf32> to vector<2x32xf32>
    %29 = arith.mulf %26, %13 : vector<2x32xf32>
    %30 = arith.mulf %25, %27 : vector<2x32xf32>
    %31 = arith.addf %29, %30 : vector<2x32xf32>
    %32 = math.tanh %31 : vector<2x32xf32>
    %33 = arith.mulf %28, %32 : vector<2x32xf32>
    %34 = math.tanh %33 : vector<2x32xf32>
    %35 = arith.index_cast %c0_i32 : i32 to index
    %c0_24 = arith.constant 0 : index
    %c0_25 = arith.constant 0 : index
    %36 = vector.load %arg10[%35, %c0_24, %c0_25] : memref<8x2x32xf32, #tpu.memory_space<vmem>>, vector<1x2x32xf32>
    %37 = vector.shape_cast %36 : vector<1x2x32xf32> to vector<2x32xf32>
    %38 = vector.shape_cast %34 : vector<2x32xf32> to vector<1x2x32xf32>
    tpu.vector_store %arg10[%35, %c0_24, %c0_25], %38 {strides = array<i32>} : memref<8x2x32xf32, #tpu.memory_space<vmem>>, vector<1x2x32xf32>,
    %c1_i32 = arith.constant 1 : i32
    %c2_i32_26 = arith.constant 2 : i32
    %39 = arith.muli %c1_i32, %c2_i32_26 : i32
    %40 = arith.index_cast %39 : i32 to index
    %c0_27 = arith.constant 0 : index
    %41 = vector.load %arg12[%40, %c0_27] : memref<16x128xf32, #tpu.memory_space<vmem>>, vector<2x128xf32>
    %cst_28 = arith.constant dense<0.000000e+00> : vector<2x128xf32>
    %42 = tpu.matmul %33, %0, %cst_28 {dimension_numbers = #tpu.dot_dimension_numbers<[1], [0], [0], [1], [0, 0, 1, 1], [], []>} : vector<2x32xf32>, vector<32x128xf32>, vector<2x128xf32> -> vector<2x128xf32>
    %43 = arith.addf %41, %42 : vector<2x128xf32>
    %44 = arith.negf %43 : vector<2x128xf32>
    %45 = math.exp %44 : vector<2x128xf32>
    %cst_29 = arith.constant 1.000000e+00 : f32
    %46 = vector.broadcast %cst_29 : f32 to vector<2x128xf32>
    %47 = arith.addf %46, %45 : vector<2x128xf32>
    %48 = arith.divf %46, %47 : vector<2x128xf32>
    %49 = math.tanh %43 : vector<2x128xf32>
    %50 = vector.extract_strided_slice %48 {offsets = [0, 0], sizes = [2, 32], strides = [1, 1]} : vector<2x128xf32> to vector<2x32xf32>
    %51 = vector.extract_strided_slice %48 {offsets = [0, 32], sizes = [2, 32], strides = [1, 1]} : vector<2x128xf32> to vector<2x32xf32>
    %52 = vector.extract_strided_slice %49 {offsets = [0, 64], sizes = [2, 32], strides = [1, 1]} : vector<2x128xf32> to vector<2x32xf32>
    %53 = vector.extract_strided_slice %48 {offsets = [0, 96], sizes = [2, 32], strides = [1, 1]} : vector<2x128xf32> to vector<2x32xf32>
    %54 = arith.mulf %51, %31 : vector<2x32xf32>
    %55 = arith.mulf %50, %52 : vector<2x32xf32>
    %56 = arith.addf %54, %55 : vector<2x32xf32>
    %57 = math.tanh %56 : vector<2x32xf32>
    %58 = arith.mulf %53, %57 : vector<2x32xf32>
    %59 = math.tanh %58 : vector<2x32xf32>
    %60 = arith.index_cast %c1_i32 : i32 to index
    %c0_30 = arith.constant 0 : index
    %c0_31 = arith.constant 0 : index
    %61 = vector.load %arg10[%60, %c0_30, %c0_31] : memref<8x2x32xf32, #tpu.memory_space<vmem>>, vector<1x2x32xf32>
    %62 = vector.shape_cast %61 : vector<1x2x32xf32> to vector<2x32xf32>
    %63 = vector.shape_cast %59 : vector<2x32xf32> to vector<1x2x32xf32>
    tpu.vector_store %arg10[%60, %c0_30, %c0_31], %63 {strides = array<i32>} : memref<8x2x32xf32, #tpu.memory_space<vmem>>, vector<1x2x32xf32>,
    %c2_i32_32 = arith.constant 2 : i32
    %c2_i32_33 = arith.constant 2 : i32
    %64 = arith.muli %c2_i32_32, %c2_i32_33 : i32
    %65 = arith.index_cast %64 : i32 to index
    %c0_34 = arith.constant 0 : index
    %66 = vector.load %arg12[%65, %c0_34] : memref<16x128xf32, #tpu.memory_space<vmem>>, vector<2x128xf32>
    %cst_35 = arith.constant dense<0.000000e+00> : vector<2x128xf32>
    %67 = tpu.matmul %58, %0, %cst_35 {dimension_numbers = #tpu.dot_dimension_numbers<[1], [0], [0], [1], [0, 0, 1, 1], [], []>} : vector<2x32xf32>, vector<32x128xf32>, vector<2x128xf32> -> vector<2x128xf32>
    %68 = arith.addf %66, %67 : vector<2x128xf32>
    %69 = arith.negf %68 : vector<2x128xf32>
    %70 = math.exp %69 : vector<2x128xf32>
    %cst_36 = arith.constant 1.000000e+00 : f32
    %71 = vector.broadcast %cst_36 : f32 to vector<2x128xf32>
    %72 = arith.addf %71, %70 : vector<2x128xf32>
    %73 = arith.divf %71, %72 : vector<2x128xf32>
    %74 = math.tanh %68 : vector<2x128xf32>
    %75 = vector.extract_strided_slice %73 {offsets = [0, 0], sizes = [2, 32], strides = [1, 1]} : vector<2x128xf32> to vector<2x32xf32>
    %76 = vector.extract_strided_slice %73 {offsets = [0, 32], sizes = [2, 32], strides = [1, 1]} : vector<2x128xf32> to vector<2x32xf32>
    %77 = vector.extract_strided_slice %74 {offsets = [0, 64], sizes = [2, 32], strides = [1, 1]} : vector<2x128xf32> to vector<2x32xf32>
    %78 = vector.extract_strided_slice %73 {offsets = [0, 96], sizes = [2, 32], strides = [1, 1]} : vector<2x128xf32> to vector<2x32xf32>
    %79 = arith.mulf %76, %56 : vector<2x32xf32>
    %80 = arith.mulf %75, %77 : vector<2x32xf32>
    %81 = arith.addf %79, %80 : vector<2x32xf32>
    %82 = math.tanh %81 : vector<2x32xf32>
    %83 = arith.mulf %78, %82 : vector<2x32xf32>
    %84 = math.tanh %83 : vector<2x32xf32>
    %85 = arith.index_cast %c2_i32_32 : i32 to index
    %c0_37 = arith.constant 0 : index
    %c0_38 = arith.constant 0 : index
    %86 = vector.load %arg10[%85, %c0_37, %c0_38] : memref<8x2x32xf32, #tpu.memory_space<vmem>>, vector<1x2x32xf32>
    %87 = vector.shape_cast %86 : vector<1x2x32xf32> to vector<2x32xf32>
    %88 = vector.shape_cast %84 : vector<2x32xf32> to vector<1x2x32xf32>
    tpu.vector_store %arg10[%85, %c0_37, %c0_38], %88 {strides = array<i32>} : memref<8x2x32xf32, #tpu.memory_space<vmem>>, vector<1x2x32xf32>,
    %c3_i32 = arith.constant 3 : i32
    %c2_i32_39 = arith.constant 2 : i32
    %89 = arith.muli %c3_i32, %c2_i32_39 : i32
    %90 = arith.index_cast %89 : i32 to index
    %c0_40 = arith.constant 0 : index
    %91 = vector.load %arg12[%90, %c0_40] : memref<16x128xf32, #tpu.memory_space<vmem>>, vector<2x128xf32>
    %cst_41 = arith.constant dense<0.000000e+00> : vector<2x128xf32>
    %92 = tpu.matmul %83, %0, %cst_41 {dimension_numbers = #tpu.dot_dimension_numbers<[1], [0], [0], [1], [0, 0, 1, 1], [], []>} : vector<2x32xf32>, vector<32x128xf32>, vector<2x128xf32> -> vector<2x128xf32>
    %93 = arith.addf %91, %92 : vector<2x128xf32>
    %94 = arith.negf %93 : vector<2x128xf32>
    %95 = math.exp %94 : vector<2x128xf32>
    %cst_42 = arith.constant 1.000000e+00 : f32
    %96 = vector.broadcast %cst_42 : f32 to vector<2x128xf32>
    %97 = arith.addf %96, %95 : vector<2x128xf32>
    %98 = arith.divf %96, %97 : vector<2x128xf32>
    %99 = math.tanh %93 : vector<2x128xf32>
    %100 = vector.extract_strided_slice %98 {offsets = [0, 0], sizes = [2, 32], strides = [1, 1]} : vector<2x128xf32> to vector<2x32xf32>
    %101 = vector.extract_strided_slice %98 {offsets = [0, 32], sizes = [2, 32], strides = [1, 1]} : vector<2x128xf32> to vector<2x32xf32>
    %102 = vector.extract_strided_slice %99 {offsets = [0, 64], sizes = [2, 32], strides = [1, 1]} : vector<2x128xf32> to vector<2x32xf32>
    %103 = vector.extract_strided_slice %98 {offsets = [0, 96], sizes = [2, 32], strides = [1, 1]} : vector<2x128xf32> to vector<2x32xf32>
    %104 = arith.mulf %101, %81 : vector<2x32xf32>
    %105 = arith.mulf %100, %102 : vector<2x32xf32>
    %106 = arith.addf %104, %105 : vector<2x32xf32>
    %107 = math.tanh %106 : vector<2x32xf32>
    %108 = arith.mulf %103, %107 : vector<2x32xf32>
    %109 = math.tanh %108 : vector<2x32xf32>
    %110 = arith.index_cast %c3_i32 : i32 to index
    %c0_43 = arith.constant 0 : index
    %c0_44 = arith.constant 0 : index
    %111 = vector.load %arg10[%110, %c0_43, %c0_44] : memref<8x2x32xf32, #tpu.memory_space<vmem>>, vector<1x2x32xf32>
    %112 = vector.shape_cast %111 : vector<1x2x32xf32> to vector<2x32xf32>
    %113 = vector.shape_cast %109 : vector<2x32xf32> to vector<1x2x32xf32>
    tpu.vector_store %arg10[%110, %c0_43, %c0_44], %113 {strides = array<i32>} : memref<8x2x32xf32, #tpu.memory_space<vmem>>, vector<1x2x32xf32>,
    %c4_i32 = arith.constant 4 : i32
    %c2_i32_45 = arith.constant 2 : i32
    %114 = arith.muli %c4_i32, %c2_i32_45 : i32
    %115 = arith.index_cast %114 : i32 to index
    %c0_46 = arith.constant 0 : index
    %116 = vector.load %arg12[%115, %c0_46] : memref<16x128xf32, #tpu.memory_space<vmem>>, vector<2x128xf32>
    %cst_47 = arith.constant dense<0.000000e+00> : vector<2x128xf32>
    %117 = tpu.matmul %108, %0, %cst_47 {dimension_numbers = #tpu.dot_dimension_numbers<[1], [0], [0], [1], [0, 0, 1, 1], [], []>} : vector<2x32xf32>, vector<32x128xf32>, vector<2x128xf32> -> vector<2x128xf32>
    %118 = arith.addf %116, %117 : vector<2x128xf32>
    %119 = arith.negf %118 : vector<2x128xf32>
    %120 = math.exp %119 : vector<2x128xf32>
    %cst_48 = arith.constant 1.000000e+00 : f32
    %121 = vector.broadcast %cst_48 : f32 to vector<2x128xf32>
    %122 = arith.addf %121, %120 : vector<2x128xf32>
    %123 = arith.divf %121, %122 : vector<2x128xf32>
    %124 = math.tanh %118 : vector<2x128xf32>
    %125 = vector.extract_strided_slice %123 {offsets = [0, 0], sizes = [2, 32], strides = [1, 1]} : vector<2x128xf32> to vector<2x32xf32>
    %126 = vector.extract_strided_slice %123 {offsets = [0, 32], sizes = [2, 32], strides = [1, 1]} : vector<2x128xf32> to vector<2x32xf32>
    %127 = vector.extract_strided_slice %124 {offsets = [0, 64], sizes = [2, 32], strides = [1, 1]} : vector<2x128xf32> to vector<2x32xf32>
    %128 = vector.extract_strided_slice %123 {offsets = [0, 96], sizes = [2, 32], strides = [1, 1]} : vector<2x128xf32> to vector<2x32xf32>
    %129 = arith.mulf %126, %106 : vector<2x32xf32>
    %130 = arith.mulf %125, %127 : vector<2x32xf32>
    %131 = arith.addf %129, %130 : vector<2x32xf32>
    %132 = math.tanh %131 : vector<2x32xf32>
    %133 = arith.mulf %128, %132 : vector<2x32xf32>
    %134 = math.tanh %133 : vector<2x32xf32>
    %135 = arith.index_cast %c4_i32 : i32 to index
    %c0_49 = arith.constant 0 : index
    %c0_50 = arith.constant 0 : index
    %136 = vector.load %arg10[%135, %c0_49, %c0_50] : memref<8x2x32xf32, #tpu.memory_space<vmem>>, vector<1x2x32xf32>
    %137 = vector.shape_cast %136 : vector<1x2x32xf32> to vector<2x32xf32>
    %138 = vector.shape_cast %134 : vector<2x32xf32> to vector<1x2x32xf32>
    tpu.vector_store %arg10[%135, %c0_49, %c0_50], %138 {strides = array<i32>} : memref<8x2x32xf32, #tpu.memory_space<vmem>>, vector<1x2x32xf32>,
    %c5_i32 = arith.constant 5 : i32
    %c2_i32_51 = arith.constant 2 : i32
    %139 = arith.muli %c5_i32, %c2_i32_51 : i32
    %140 = arith.index_cast %139 : i32 to index
    %c0_52 = arith.constant 0 : index
    %141 = vector.load %arg12[%140, %c0_52] : memref<16x128xf32, #tpu.memory_space<vmem>>, vector<2x128xf32>
    %cst_53 = arith.constant dense<0.000000e+00> : vector<2x128xf32>
    %142 = tpu.matmul %133, %0, %cst_53 {dimension_numbers = #tpu.dot_dimension_numbers<[1], [0], [0], [1], [0, 0, 1, 1], [], []>} : vector<2x32xf32>, vector<32x128xf32>, vector<2x128xf32> -> vector<2x128xf32>
    %143 = arith.addf %141, %142 : vector<2x128xf32>
    %144 = arith.negf %143 : vector<2x128xf32>
    %145 = math.exp %144 : vector<2x128xf32>
    %cst_54 = arith.constant 1.000000e+00 : f32
    %146 = vector.broadcast %cst_54 : f32 to vector<2x128xf32>
    %147 = arith.addf %146, %145 : vector<2x128xf32>
    %148 = arith.divf %146, %147 : vector<2x128xf32>
    %149 = math.tanh %143 : vector<2x128xf32>
    %150 = vector.extract_strided_slice %148 {offsets = [0, 0], sizes = [2, 32], strides = [1, 1]} : vector<2x128xf32> to vector<2x32xf32>
    %151 = vector.extract_strided_slice %148 {offsets = [0, 32], sizes = [2, 32], strides = [1, 1]} : vector<2x128xf32> to vector<2x32xf32>
    %152 = vector.extract_strided_slice %149 {offsets = [0, 64], sizes = [2, 32], strides = [1, 1]} : vector<2x128xf32> to vector<2x32xf32>
    %153 = vector.extract_strided_slice %148 {offsets = [0, 96], sizes = [2, 32], strides = [1, 1]} : vector<2x128xf32> to vector<2x32xf32>
    %154 = arith.mulf %151, %131 : vector<2x32xf32>
    %155 = arith.mulf %150, %152 : vector<2x32xf32>
    %156 = arith.addf %154, %155 : vector<2x32xf32>
    %157 = math.tanh %156 : vector<2x32xf32>
    %158 = arith.mulf %153, %157 : vector<2x32xf32>
    %159 = math.tanh %158 : vector<2x32xf32>
    %160 = arith.index_cast %c5_i32 : i32 to index
    %c0_55 = arith.constant 0 : index
    %c0_56 = arith.constant 0 : index
    %161 = vector.load %arg10[%160, %c0_55, %c0_56] : memref<8x2x32xf32, #tpu.memory_space<vmem>>, vector<1x2x32xf32>
    %162 = vector.shape_cast %161 : vector<1x2x32xf32> to vector<2x32xf32>
    %163 = vector.shape_cast %159 : vector<2x32xf32> to vector<1x2x32xf32>
    tpu.vector_store %arg10[%160, %c0_55, %c0_56], %163 {strides = array<i32>} : memref<8x2x32xf32, #tpu.memory_space<vmem>>, vector<1x2x32xf32>,
    %c6_i32 = arith.constant 6 : i32
    %c2_i32_57 = arith.constant 2 : i32
    %164 = arith.muli %c6_i32, %c2_i32_57 : i32
    %165 = arith.index_cast %164 : i32 to index
    %c0_58 = arith.constant 0 : index
    %166 = vector.load %arg12[%165, %c0_58] : memref<16x128xf32, #tpu.memory_space<vmem>>, vector<2x128xf32>
    %cst_59 = arith.constant dense<0.000000e+00> : vector<2x128xf32>
    %167 = tpu.matmul %158, %0, %cst_59 {dimension_numbers = #tpu.dot_dimension_numbers<[1], [0], [0], [1], [0, 0, 1, 1], [], []>} : vector<2x32xf32>, vector<32x128xf32>, vector<2x128xf32> -> vector<2x128xf32>
    %168 = arith.addf %166, %167 : vector<2x128xf32>
    %169 = arith.negf %168 : vector<2x128xf32>
    %170 = math.exp %169 : vector<2x128xf32>
    %cst_60 = arith.constant 1.000000e+00 : f32
    %171 = vector.broadcast %cst_60 : f32 to vector<2x128xf32>
    %172 = arith.addf %171, %170 : vector<2x128xf32>
    %173 = arith.divf %171, %172 : vector<2x128xf32>
    %174 = math.tanh %168 : vector<2x128xf32>
    %175 = vector.extract_strided_slice %173 {offsets = [0, 0], sizes = [2, 32], strides = [1, 1]} : vector<2x128xf32> to vector<2x32xf32>
    %176 = vector.extract_strided_slice %173 {offsets = [0, 32], sizes = [2, 32], strides = [1, 1]} : vector<2x128xf32> to vector<2x32xf32>
    %177 = vector.extract_strided_slice %174 {offsets = [0, 64], sizes = [2, 32], strides = [1, 1]} : vector<2x128xf32> to vector<2x32xf32>
    %178 = vector.extract_strided_slice %173 {offsets = [0, 96], sizes = [2, 32], strides = [1, 1]} : vector<2x128xf32> to vector<2x32xf32>
    %179 = arith.mulf %176, %156 : vector<2x32xf32>
    %180 = arith.mulf %175, %177 : vector<2x32xf32>
    %181 = arith.addf %179, %180 : vector<2x32xf32>
    %182 = math.tanh %181 : vector<2x32xf32>
    %183 = arith.mulf %178, %182 : vector<2x32xf32>
    %184 = math.tanh %183 : vector<2x32xf32>
    %185 = arith.index_cast %c6_i32 : i32 to index
    %c0_61 = arith.constant 0 : index
    %c0_62 = arith.constant 0 : index
    %186 = vector.load %arg10[%185, %c0_61, %c0_62] : memref<8x2x32xf32, #tpu.memory_space<vmem>>, vector<1x2x32xf32>
    %187 = vector.shape_cast %186 : vector<1x2x32xf32> to vector<2x32xf32>
    %188 = vector.shape_cast %184 : vector<2x32xf32> to vector<1x2x32xf32>
    tpu.vector_store %arg10[%185, %c0_61, %c0_62], %188 {strides = array<i32>} : memref<8x2x32xf32, #tpu.memory_space<vmem>>, vector<1x2x32xf32>,
    %c7_i32 = arith.constant 7 : i32
    %c2_i32_63 = arith.constant 2 : i32
    %189 = arith.muli %c7_i32, %c2_i32_63 : i32
    %190 = arith.index_cast %189 : i32 to index
    %c0_64 = arith.constant 0 : index
    %191 = vector.load %arg12[%190, %c0_64] : memref<16x128xf32, #tpu.memory_space<vmem>>, vector<2x128xf32>
    %cst_65 = arith.constant dense<0.000000e+00> : vector<2x128xf32>
    %192 = tpu.matmul %183, %0, %cst_65 {dimension_numbers = #tpu.dot_dimension_numbers<[1], [0], [0], [1], [0, 0, 1, 1], [], []>} : vector<2x32xf32>, vector<32x128xf32>, vector<2x128xf32> -> vector<2x128xf32>
    %193 = arith.addf %191, %192 : vector<2x128xf32>
    %194 = arith.negf %193 : vector<2x128xf32>
    %195 = math.exp %194 : vector<2x128xf32>
    %cst_66 = arith.constant 1.000000e+00 : f32
    %196 = vector.broadcast %cst_66 : f32 to vector<2x128xf32>
    %197 = arith.addf %196, %195 : vector<2x128xf32>
    %198 = arith.divf %196, %197 : vector<2x128xf32>
    %199 = math.tanh %193 : vector<2x128xf32>
    %200 = vector.extract_strided_slice %198 {offsets = [0, 0], sizes = [2, 32], strides = [1, 1]} : vector<2x128xf32> to vector<2x32xf32>
    %201 = vector.extract_strided_slice %198 {offsets = [0, 32], sizes = [2, 32], strides = [1, 1]} : vector<2x128xf32> to vector<2x32xf32>
    %202 = vector.extract_strided_slice %199 {offsets = [0, 64], sizes = [2, 32], strides = [1, 1]} : vector<2x128xf32> to vector<2x32xf32>
    %203 = vector.extract_strided_slice %198 {offsets = [0, 96], sizes = [2, 32], strides = [1, 1]} : vector<2x128xf32> to vector<2x32xf32>
    %204 = arith.mulf %201, %181 : vector<2x32xf32>
    %205 = arith.mulf %200, %202 : vector<2x32xf32>
    %206 = arith.addf %204, %205 : vector<2x32xf32>
    %207 = math.tanh %206 : vector<2x32xf32>
    %208 = arith.mulf %203, %207 : vector<2x32xf32>
    %209 = math.tanh %208 : vector<2x32xf32>
    %210 = arith.index_cast %c7_i32 : i32 to index
    %c0_67 = arith.constant 0 : index
    %c0_68 = arith.constant 0 : index
    %211 = vector.load %arg10[%210, %c0_67, %c0_68] : memref<8x2x32xf32, #tpu.memory_space<vmem>>, vector<1x2x32xf32>
    %212 = vector.shape_cast %211 : vector<1x2x32xf32> to vector<2x32xf32>
    %213 = vector.shape_cast %209 : vector<2x32xf32> to vector<1x2x32xf32>
    tpu.vector_store %arg10[%210, %c0_67, %c0_68], %213 {strides = array<i32>} : memref<8x2x32xf32, #tpu.memory_space<vmem>>, vector<1x2x32xf32>,
    %c8_i32 = arith.constant 8 : i32
    %214 = math.tanh %208 : vector<2x32xf32>
    %cst_69 = arith.constant dense<0.000000e+00> : vector<2x32xf32>
    %215 = tpu.matmul %214, %1, %cst_69 {dimension_numbers = #tpu.dot_dimension_numbers<[1], [0], [0], [1], [0, 0, 1, 1], [], []>} : vector<2x32xf32>, vector<32x32xf32>, vector<2x32xf32> -> vector<2x32xf32>
    %216 = vector.broadcast %2 : vector<1x32xf32> to vector<2x32xf32>
    %217 = arith.addf %215, %216 : vector<2x32xf32>
    %cst_70 = arith.constant dense<0.000000e+00> : vector<2x4xf32>
    %218 = tpu.matmul %217, %3, %cst_70 {dimension_numbers = #tpu.dot_dimension_numbers<[1], [0], [0], [1], [0, 0, 1, 1], [], []>} : vector<2x32xf32>, vector<32x4xf32>, vector<2x4xf32> -> vector<2x4xf32>
    %219 = vector.broadcast %4 : vector<1x4xf32> to vector<2x4xf32>
    %220 = arith.addf %218, %219 : vector<2x4xf32>
    %c0_71 = arith.constant 0 : index
    %c0_72 = arith.constant 0 : index
    %221 = vector.load %arg11[%c0_71, %c0_72] : memref<2x4xf32, #tpu.memory_space<vmem>>, vector<2x4xf32>
    tpu.vector_store %arg11[%c0_71, %c0_72], %220 {strides = array<i32>} : memref<2x4xf32, #tpu.memory_space<vmem>>, vector<2x4xf32>,
    return
  }
}

</mosaic_0001>

<bundles_post_ra>
// kernel: lstm_network_forward.1
= control target key start
LH: loop header
LB: loop body
LE: loop exit
PB: predicated region body
PF: predicated region fallthrough
CT: control target
= control target key end

     0   :  { %vm69_vm0 = vcmask 1043456   ;;  %vm62_vm1 = vcmask 31744   ;;  %v1502_v4 = vmov 0.0   ;;  %s1836_s0 = inlined_call_operand.vmem [shape: f32[16,4], index: 0, kind: input, shape index: {}]   ;;  %s1837_s1 = inlined_call_operand.vmem [shape: f32[2,32], index: 1, kind: input, shape index: {}]   ;;  %s1838_s2 = inlined_call_operand.vmem [shape: f32[2,32], index: 2, kind: input, shape index: {}]   ;;  %s1839_s3 = inlined_call_operand.vmem [shape: f32[4,128], index: 3, kind: input, shape index: {}]   ;;  %s1840_s4 = inlined_call_operand.vmem [shape: f32[32,128], index: 4, kind: input, shape index: {}]   ;;  %s1841_s5 = inlined_call_operand.vmem [shape: f32[1,128], index: 5, kind: input, shape index: {}]   ;;  %s1842_s6 = inlined_call_operand.vmem [shape: f32[32,32], index: 6, kind: input, shape index: {}]   ;;  %s1843_s7 = inlined_call_operand.vmem [shape: f32[1,32], index: 7, kind: input, shape index: {}]   ;;  %s1844_s8 = inlined_call_operand.vmem [shape: f32[32,4], index: 8, kind: input, shape index: {}]   ;;  %s1845_s9 = inlined_call_operand.vmem [shape: f32[1,4], index: 9, kind: input, shape index: {}]   ;;  %s1846_s10 = inlined_call_operand.vmem [shape: f32[8,2,32], index: 10, kind: output, shape index: {0}]   ;;  %s1847_s11 = inlined_call_operand.hbm [shape: f32[2,4], index: 11, kind: output, shape index: {1}]  }
   0x1   :  { %v54_v0 = vld [vmem:[%s1839_s3] sm:$0xf]  ;;  %v53_v2 = vld [vmem:[%s1836_s0 + $0x8] sm:$0xff]  ;;  %v1579_v3 = vld [vmem:[%s1840_s4 + $0x18] sm:$0xff]  ;;  %1285 = vmatprep.subr.mxu1 %v1502_v4 }
   0x2   :  { %v52_v1 = vld [vmem:[%s1836_s0] sm:$0xff]  ;;  %1280 = vmatprep.subr.msk.mxu0 %vm69_vm0, %v54_v0  ;;  %v1585_v5 = vld [vmem:[%s1840_s4 + $0x10] sm:$0xff] }
   0x3   :  { %1282 = vmatprep.mubr.msk.f32.mxu0 %vm62_vm1, %v52_v1  ;;  %1281 = vmatpush3.msk.msra.mxu0 %vm69_vm0, %v54_v0 }
   0x4   :  { %17 = vsyncpa [#allocation4], 0  ;;  %1283 = vmatmul.mubr.msk.f32.vlgmr.msra.gmra.mxu0 %vm62_vm1, %v53_v2  ;;  %1286 = vmatpush3.msra.mxu1 %v1579_v3  ;;  %v1592_v6 = vld [vmem:[%s1840_s4 + $0x8] sm:$0xff]  ;;  %vm1503_vm2 = vmmov 0   ;;  %v1602_v7 = vld [vmem:[%s1840_s4] sm:$0xff]  ;;  %vm153_vm3 = vcmask 261120  }
   0x5   :  { %1287 = vmatprep.subr.mxu1 %v1502_v4  ;;  %1293 = vmatprep.mubr.msk.f32.mxu1 %vm1503_vm2, %v1502_v4  ;;  %v150_v8 = vld [vmem:[%s1837_s1] sm:$0x3]  ;;  %s1504_s12 = smov 64   ;;  %vm261_vm4 = vcmask 254976   ;;  %s1506_s23 = smov [#allocation3]   ;;  %vm1176_vm5 = vcmask 25600  }
   0x6   :  { %1288 = vmatpush3.msra.mxu1 %v1585_v5  ;;  %1296 = vmatprep.subr.mxu0 %v1502_v4  ;;  %v1196_v9 = vld [vmem:[%s1841_s5] ss:$0 sm:$0xff]  ;;  %s1505_s5 = smov 32   ;;  %s1186_s24 = sshll.u32 %s1506_s23, 4  ;;  %s1187_s24 = int_to_ptr.vmem [resolvable:$true] %s1186_s24 }
   0x7   :  { %1289 = vmatprep.subr.mxu1 %v1502_v4  ;;  %1297 = vmatpush3.msra.mxu0 %v1579_v3  ;;  %v151_v19 = vld [vmem:[%s1838_s2] sm:$0x3]  ;;  %p1485_p1 = scmp.lt.s32.totalorder %s1187_s24, %s1187_s24 }
   0x8   :  { %1290 = vmatpush3.msra.mxu1 %v1592_v6  ;;  %1298 = vmatprep.subr.mxu0 %v1502_v4 }
   0x9   :  { %1291 = vmatprep.subr.mxu1 %v1502_v4  ;;  %1299 = vmatpush3.msra.mxu0 %v1585_v5 }
   0xa   :  { %1292 = vmatpush3.msra.mxu1 %v1602_v7  ;;  %1300 = vmatprep.subr.mxu0 %v1502_v4 }
   0xb   :  { %1294 = vmatmul.mubr.msk.f32.vlgmr.msra.gmra.mxu1 %vm153_vm3, %v150_v8  ;;  %1301 = vmatpush3.msra.mxu0 %v1592_v6 }
   0xc   :  { %1302 = vmatprep.subr.mxu0 %v1502_v4  ;;  %1304 = vmatprep.mubr.msk.f32.mxu0 %vm1503_vm2, %v1502_v4 }
   0xd   :  { %1303 = vmatpush3.msra.mxu0 %v1602_v7  ;;  %1307 = vmatprep.subr.mxu1 %v1502_v4 }
   0xe   :  { %1308 = vmatpush3.msra.mxu1 %v1579_v3  ;;  %1315 = vmatprep.mubr.msk.f32.mxu1 %vm1503_vm2, %v1502_v4 }
   0xf   :  { %1309 = vmatprep.subr.mxu1 %v1502_v4  ;;  %1318 = vmatprep.subr.mxu0 %v1502_v4 }
  0x10   :  { %1310 = vmatpush3.msra.mxu1 %v1585_v5 }
  0x11   :  { %1311 = vmatprep.subr.mxu1 %v1502_v4 }
  0x12   :  { %1312 = vmatpush3.msra.mxu1 %v1592_v6 }
  0x13   :  { %1313 = vmatprep.subr.mxu1 %v1502_v4 }
  0x14   :  { %1314 = vmatpush3.msra.mxu1 %v1602_v7 }
  0x15   :  { %1329 = vmatprep.subr.mxu1 %v1502_v4 }
  0xc4   :  { %v1284_v10 = vpop.f32.mrf.mxu0 }
  0xc5   :  { %v145_v11 = vadd.f32 %v1284_v10, %v1196_v9 }
  0xc6   :  { %v139_v12 = vpop.f32.mrf.mxu0 }
  0xc7   :  { %149 = vst [vmem:[#allocation2 + $0x8] sm:$0xff] %v145_v11  ;;  %v140_v13 = vadd.f32 %v1196_v9, %v139_v12 }
  0xc9   :  { %148 = vst [vmem:[#allocation2] sm:$0xff] %v140_v13 }
  0xcb   :  { %v223_v14 = vpop.f32.mrf.mxu1 }
  0xcd   :  { %v1295_v15 = vpop.f32.mrf.mxu1 }
  0xd0   :  { %v152_v16 = vld [vmem:[#allocation2] sm:$0x3]  ;;  %v263_v34 = vld [vmem:[#allocation2 + $0x2] sm:$0x3]  ;;  %v371_v52 = vld [vmem:[#allocation2 + $0x4] sm:$0x3] }
  0xd1   :  { %v227_v17 = vadd.f32 %v223_v14, %v152_v16  ;;  %v479_v11 = vld [vmem:[#allocation2 + $0x6] sm:$0x3] }
  0xd3   :  { %1400 = vtanh.f32 %v227_v17  ;;  %v1201_v20 = vmul.f32 -1.442695, %v227_v17 }
  0xd5   :  { %1402 = vpow2.f32 %v1201_v20 }
  0xe0   :  { %v1401_v18 = vpop.eup %1400 }
  0xe1   :  { %241 = vrot.lane.b32.xlu0 %v1401_v18, %s1504_s12 }
  0xe2   :  { %v1403_v21 = vpop.eup %1402 }
  0xe3   :  { %v231_v22 = vadd.f32 1.0, %v1403_v21 }
  0xe5   :  { %236 = vrot.lane.b32.xlu0 %v151_v19, %s1505_s5  ;;  %1404 = vrcp.f32 %v231_v22 }
  0xf2   :  { %v1405_v23 = vpop.eup %1404 }
 0x153   :  { %v242_v24 = vpop.permute.xlu0 %241 }
 0x154   :  { %v244_v25 = vmul.f32 %v1405_v23, %v242_v24 }
 0x156   :  { %246 = vrot.lane.b32.xlu1 %v244_v25, %s1505_s5 }
 0x157   :  { %v237_v26 = vpop.permute.xlu0 %236 }
 0x158   :  { %v239_v27 = vmul.f32 %v1405_v23, %v237_v26 }
 0x1c8   :  { %v247_v28 = vpop.permute.xlu1 %246 }
 0x1c9   :  { %v249_v29 = vadd.f32 %v247_v28, %v239_v27 }
 0x1cb   :  { %1406 = vtanh.f32 %v249_v29 }
 0x1d8   :  { %v1407_v30 = vpop.eup %1406 }
 0x1d9   :  { %252 = vrot.lane.b32.xlu1 %v1407_v30, %s1504_s12 }
 0x24b   :  { %v253_v31 = vpop.permute.xlu1 %252 }
 0x24c   :  { %v1642_v32 = vmul.f32 %v1405_v23, %v253_v31 }
 0x24e   :  { %265 = vrot.lane.b32.xlu0 %v1642_v32, %s1505_s5 }
 0x2c0   :  { %v266_v33 = vpop.permute.xlu0 %265 }
 0x2c1   :  { %1305 = vmatmul.mubr.msk.f32.vlgmr.msra.gmra.mxu0 %vm153_vm3, %v266_v33 }
 0x2c2   :  { %1319 = vmatpush3.msra.mxu0 %v1579_v3  ;;  %1326 = vmatprep.mubr.msk.f32.mxu0 %vm1503_vm2, %v1502_v4 }
 0x2c3   :  { %1320 = vmatprep.subr.mxu0 %v1502_v4 }
 0x2c4   :  { %1321 = vmatpush3.msra.mxu0 %v1585_v5 }
 0x2c5   :  { %1322 = vmatprep.subr.mxu0 %v1502_v4 }
 0x2c6   :  { %1323 = vmatpush3.msra.mxu0 %v1592_v6 }
 0x2c7   :  { %1324 = vmatprep.subr.mxu0 %v1502_v4 }
 0x2c8   :  { %1325 = vmatpush3.msra.mxu0 %v1602_v7 }
 0x2c9   :  { %1340 = vmatprep.subr.mxu0 %v1502_v4 }
 0x381   :  { %v335_v35 = vpop.f32.mrf.mxu0 }
 0x382   :  { %v339_v36 = vadd.f32 %v335_v35, %v263_v34 }
 0x383   :  { %v1306_v37 = vpop.f32.mrf.mxu0 }
 0x384   :  { %1408 = vtanh.f32 %v339_v36  ;;  %v1203_v39 = vmul.f32 -1.442695, %v339_v36 }
 0x386   :  { %1410 = vpow2.f32 %v1203_v39 }
 0x391   :  { %v1409_v38 = vpop.eup %1408 }
 0x392   :  { %349 = vrot.lane.b32.xlu1 %v1409_v38, %s1504_s12 }
 0x393   :  { %v1411_v40 = vpop.eup %1410 }
 0x394   :  { %v343_v41 = vadd.f32 1.0, %v1411_v40 }
 0x396   :  { %1412 = vrcp.f32 %v343_v41 }
 0x3a3   :  { %v1413_v42 = vpop.eup %1412 }
 0x3a4   :  { %v347_v45 = vmul.f32 %v1413_v42, %v249_v29  ;;  %v587_v29 = vld [vmem:[#allocation2 + $0x8] sm:$0x3] }
 0x404   :  { %v350_v43 = vpop.permute.xlu1 %349 }
 0x405   :  { %v352_v44 = vmul.f32 %v1413_v42, %v350_v43 }
 0x407   :  { %354 = vrot.lane.b32.xlu0 %v352_v44, %s1505_s5 }
 0x479   :  { %v355_v46 = vpop.permute.xlu0 %354 }
 0x47a   :  { %v357_v47 = vadd.f32 %v355_v46, %v347_v45 }
 0x47c   :  { %1414 = vtanh.f32 %v357_v47 }
 0x489   :  { %v1415_v48 = vpop.eup %1414 }
 0x48a   :  { %360 = vrot.lane.b32.xlu1 %v1415_v48, %s1504_s12  ;;  %v695_v48 = vld [vmem:[#allocation2 + $0xa] sm:$0x3] }
 0x4fc   :  { %v361_v49 = vpop.permute.xlu1 %360 }
 0x4fd   :  { %v1660_v50 = vmul.f32 %v1413_v42, %v361_v49 }
 0x4ff   :  { %373 = vrot.lane.b32.xlu0 %v1660_v50, %s1505_s5 }
 0x571   :  { %v374_v51 = vpop.permute.xlu0 %373 }
 0x572   :  { %1316 = vmatmul.mubr.msk.f32.vlgmr.msra.gmra.mxu1 %vm153_vm3, %v374_v51 }
 0x573   :  { %1330 = vmatpush3.msra.mxu1 %v1579_v3  ;;  %1337 = vmatprep.mubr.msk.f32.mxu1 %vm1503_vm2, %v1502_v4 }
 0x574   :  { %1331 = vmatprep.subr.mxu1 %v1502_v4 }
 0x575   :  { %1332 = vmatpush3.msra.mxu1 %v1585_v5 }
 0x576   :  { %1333 = vmatprep.subr.mxu1 %v1502_v4 }
 0x577   :  { %1334 = vmatpush3.msra.mxu1 %v1592_v6 }
 0x578   :  { %1335 = vmatprep.subr.mxu1 %v1502_v4 }
 0x579   :  { %1336 = vmatpush3.msra.mxu1 %v1602_v7 }
 0x57a   :  { %1351 = vmatprep.subr.mxu1 %v1502_v4 }
 0x632   :  { %v443_v53 = vpop.f32.mrf.mxu1 }
 0x633   :  { %v447_v54 = vadd.f32 %v443_v53, %v371_v52 }
 0x634   :  { %v1317_v55 = vpop.f32.mrf.mxu1 }
 0x635   :  { %1416 = vtanh.f32 %v447_v54  ;;  %v1206_v57 = vmul.f32 -1.442695, %v447_v54 }
 0x637   :  { %1418 = vpow2.f32 %v1206_v57 }
 0x642   :  { %v1417_v56 = vpop.eup %1416 }
 0x643   :  { %457 = vrot.lane.b32.xlu1 %v1417_v56, %s1504_s12 }
 0x644   :  { %v1419_v58 = vpop.eup %1418 }
 0x645   :  { %v451_v59 = vadd.f32 1.0, %v1419_v58 }
 0x647   :  { %1420 = vrcp.f32 %v451_v59 }
 0x654   :  { %v1421_v60 = vpop.eup %1420 }
 0x655   :  { %v455_v63 = vmul.f32 %v1421_v60, %v357_v47 }
 0x6b5   :  { %v458_v61 = vpop.permute.xlu1 %457 }
 0x6b6   :  { %v460_v62 = vmul.f32 %v1421_v60, %v458_v61 }
 0x6b8   :  { %462 = vrot.lane.b32.xlu0 %v460_v62, %s1505_s5 }
 0x72a   :  { %v463_v0 = vpop.permute.xlu0 %462 }
 0x72b   :  { %v465_v1 = vadd.f32 %v463_v0, %v455_v63  ;;  %v803_v63 = vld [vmem:[#allocation2 + $0xc] sm:$0x3] }
 0x72d   :  { %1422 = vtanh.f32 %v465_v1 }
 0x73a   :  { %v1423_v2 = vpop.eup %1422 }
 0x73b   :  { %468 = vrot.lane.b32.xlu1 %v1423_v2, %s1504_s12 }
 0x7ad   :  { %v469_v8 = vpop.permute.xlu1 %468 }
 0x7ae   :  { %v1678_v9 = vmul.f32 %v1421_v60, %v469_v8 }
 0x7b0   :  { %481 = vrot.lane.b32.xlu0 %v1678_v9, %s1505_s5 }
 0x822   :  { %v482_v10 = vpop.permute.xlu0 %481 }
 0x823   :  { %1327 = vmatmul.mubr.msk.f32.vlgmr.msra.gmra.mxu0 %vm153_vm3, %v482_v10 }
 0x824   :  { %1341 = vmatpush3.msra.mxu0 %v1579_v3  ;;  %1348 = vmatprep.mubr.msk.f32.mxu0 %vm1503_vm2, %v1502_v4 }
 0x825   :  { %1342 = vmatprep.subr.mxu0 %v1502_v4 }
 0x826   :  { %1343 = vmatpush3.msra.mxu0 %v1585_v5 }
 0x827   :  { %1344 = vmatprep.subr.mxu0 %v1502_v4 }
 0x828   :  { %1345 = vmatpush3.msra.mxu0 %v1592_v6 }
 0x829   :  { %1346 = vmatprep.subr.mxu0 %v1502_v4 }
 0x82a   :  { %1347 = vmatpush3.msra.mxu0 %v1602_v7 }
 0x82b   :  { %1362 = vmatprep.subr.mxu0 %v1502_v4 }
 0x8e3   :  { %v551_v12 = vpop.f32.mrf.mxu0 }
 0x8e4   :  { %v555_v13 = vadd.f32 %v551_v12, %v479_v11 }
 0x8e5   :  { %v1328_v14 = vpop.f32.mrf.mxu0 }
 0x8e6   :  { %1424 = vtanh.f32 %v555_v13  ;;  %v1209_v16 = vmul.f32 -1.442695, %v555_v13 }
 0x8e8   :  { %1426 = vpow2.f32 %v1209_v16 }
 0x8f3   :  { %v1425_v15 = vpop.eup %1424 }
 0x8f4   :  { %565 = vrot.lane.b32.xlu1 %v1425_v15, %s1504_s12 }
 0x8f5   :  { %v1427_v17 = vpop.eup %1426 }
 0x8f6   :  { %v559_v18 = vadd.f32 1.0, %v1427_v17 }
 0x8f8   :  { %1428 = vrcp.f32 %v559_v18 }
 0x905   :  { %v1429_v19 = vpop.eup %1428 }
 0x906   :  { %v563_v22 = vmul.f32 %v1429_v19, %v465_v1 }
 0x966   :  { %v566_v20 = vpop.permute.xlu1 %565 }
 0x967   :  { %v568_v21 = vmul.f32 %v1429_v19, %v566_v20 }
 0x969   :  { %570 = vrot.lane.b32.xlu0 %v568_v21, %s1505_s5 }
 0x9db   :  { %v571_v23 = vpop.permute.xlu0 %570 }
 0x9dc   :  { %v573_v24 = vadd.f32 %v571_v23, %v563_v22  ;;  %v911_v23 = vld [vmem:[#allocation2 + $0xe] sm:$0x3] }
 0x9de   :  { %1430 = vtanh.f32 %v573_v24 }
 0x9eb   :  { %v1431_v25 = vpop.eup %1430 }
 0x9ec   :  { %576 = vrot.lane.b32.xlu1 %v1431_v25, %s1504_s12 }
 0xa5e   :  { %v577_v26 = vpop.permute.xlu1 %576 }
 0xa5f   :  { %v1696_v27 = vmul.f32 %v1429_v19, %v577_v26 }
 0xa61   :  { %589 = vrot.lane.b32.xlu0 %v1696_v27, %s1505_s5 }
 0xad3   :  { %v590_v28 = vpop.permute.xlu0 %589 }
 0xad4   :  { %1338 = vmatmul.mubr.msk.f32.vlgmr.msra.gmra.mxu1 %vm153_vm3, %v590_v28 }
 0xad5   :  { %1352 = vmatpush3.msra.mxu1 %v1579_v3  ;;  %1359 = vmatprep.mubr.msk.f32.mxu1 %vm1503_vm2, %v1502_v4 }
 0xad6   :  { %1353 = vmatprep.subr.mxu1 %v1502_v4 }
 0xad7   :  { %1354 = vmatpush3.msra.mxu1 %v1585_v5 }
 0xad8   :  { %1355 = vmatprep.subr.mxu1 %v1502_v4 }
 0xad9   :  { %1356 = vmatpush3.msra.mxu1 %v1592_v6 }
 0xada   :  { %1357 = vmatprep.subr.mxu1 %v1502_v4 }
 0xadb   :  { %1358 = vmatpush3.msra.mxu1 %v1602_v7 }
 0xadc   :  { %1373 = vmatprep.subr.mxu1 %v1502_v4 }
 0xb94   :  { %v659_v30 = vpop.f32.mrf.mxu1 }
 0xb95   :  { %v663_v31 = vadd.f32 %v659_v30, %v587_v29 }
 0xb96   :  { %v1339_v33 = vpop.f32.mrf.mxu1 }
 0xb97   :  { %1432 = vtanh.f32 %v663_v31  ;;  %v1212_v35 = vmul.f32 -1.442695, %v663_v31 }
 0xb99   :  { %1434 = vpow2.f32 %v1212_v35 }
 0xba4   :  { %v1433_v34 = vpop.eup %1432 }
 0xba5   :  { %673 = vrot.lane.b32.xlu1 %v1433_v34, %s1504_s12 }
 0xba6   :  { %v1435_v36 = vpop.eup %1434 }
 0xba7   :  { %v667_v37 = vadd.f32 1.0, %v1435_v36 }
 0xba9   :  { %1436 = vrcp.f32 %v667_v37 }
 0xbb6   :  { %v1437_v38 = vpop.eup %1436 }
 0xbb7   :  { %v671_v41 = vmul.f32 %v1437_v38, %v573_v24 }
 0xc17   :  { %v674_v39 = vpop.permute.xlu1 %673 }
 0xc18   :  { %v676_v40 = vmul.f32 %v1437_v38, %v674_v39 }
 0xc1a   :  { %678 = vrot.lane.b32.xlu0 %v676_v40, %s1505_s5 }
 0xc8c   :  { %v679_v42 = vpop.permute.xlu0 %678 }
 0xc8d   :  { %v681_v43 = vadd.f32 %v679_v42, %v671_v41 }
 0xc8f   :  { %1438 = vtanh.f32 %v681_v43 }
 0xc9c   :  { %v1439_v44 = vpop.eup %1438 }
 0xc9d   :  { %684 = vrot.lane.b32.xlu1 %v1439_v44, %s1504_s12  ;;  %v43_v44 = vld [vmem:[%s1842_s6 + $0x8] sm:$0xff] }
 0xd0f   :  { %v685_v45 = vpop.permute.xlu1 %684 }
 0xd10   :  { %v1714_v46 = vmul.f32 %v1437_v38, %v685_v45  ;;  %v42_v45 = vld [vmem:[%s1842_s6] sm:$0xff] }
 0xd12   :  { %697 = vrot.lane.b32.xlu0 %v1714_v46, %s1505_s5 }
 0xd84   :  { %v698_v47 = vpop.permute.xlu0 %697 }
 0xd85   :  { %1349 = vmatmul.mubr.msk.f32.vlgmr.msra.gmra.mxu0 %vm153_vm3, %v698_v47 }
 0xd86   :  { %1363 = vmatpush3.msra.mxu0 %v1579_v3  ;;  %1370 = vmatprep.mubr.msk.f32.mxu0 %vm1503_vm2, %v1502_v4 }
 0xd87   :  { %1364 = vmatprep.subr.mxu0 %v1502_v4 }
 0xd88   :  { %1365 = vmatpush3.msra.mxu0 %v1585_v5 }
 0xd89   :  { %1366 = vmatprep.subr.mxu0 %v1502_v4 }
 0xd8a   :  { %1367 = vmatpush3.msra.mxu0 %v1592_v6 }
 0xd8b   :  { %1368 = vmatprep.subr.mxu0 %v1502_v4 }
 0xd8c   :  { %1369 = vmatpush3.msra.mxu0 %v1602_v7 }
 0xd8d   :  { %1384 = vmatprep.subr.mxu0 %v1502_v4 }
 0xe45   :  { %v767_v49 = vpop.f32.mrf.mxu0 }
 0xe46   :  { %v771_v3 = vadd.f32 %v767_v49, %v695_v48 }
 0xe47   :  { %v1350_v51 = vpop.f32.mrf.mxu0 }
 0xe48   :  { %1440 = vtanh.f32 %v771_v3  ;;  %v1215_v53 = vmul.f32 -1.442695, %v771_v3 }
 0xe4a   :  { %1442 = vpow2.f32 %v1215_v53  ;;  %v49_v53 = vld [vmem:[%s1844_s8 + $0x10] sm:$0xff] }
 0xe55   :  { %v1441_v52 = vpop.eup %1440 }
 0xe56   :  { %781 = vrot.lane.b32.xlu1 %v1441_v52, %s1504_s12 }
 0xe57   :  { %v1443_v5 = vpop.eup %1442 }
 0xe58   :  { %v775_v54 = vadd.f32 1.0, %v1443_v5 }
 0xe5a   :  { %1444 = vrcp.f32 %v775_v54 }
 0xe67   :  { %v1445_v6 = vpop.eup %1444 }
 0xe68   :  { %v779_v7 = vmul.f32 %v1445_v6, %v681_v43 }
 0xec8   :  { %v782_v55 = vpop.permute.xlu1 %781 }
 0xec9   :  { %v784_v56 = vmul.f32 %v1445_v6, %v782_v55 }
 0xecb   :  { %786 = vrot.lane.b32.xlu0 %v784_v56, %s1505_s5 }
 0xf3d   :  { %v787_v57 = vpop.permute.xlu0 %786 }
 0xf3e   :  { %v789_v58 = vadd.f32 %v787_v57, %v779_v7  ;;  %v48_v57 = vld [vmem:[%s1844_s8 + $0x8] sm:$0xff] }
 0xf40   :  { %1446 = vtanh.f32 %v789_v58 }
 0xf4d   :  { %v1447_v59 = vpop.eup %1446 }
 0xf4e   :  { %792 = vrot.lane.b32.xlu1 %v1447_v59, %s1504_s12  ;;  %v1223_v59 = vld [vmem:[%s1843_s7] ss:$0 sm:$0xff] }
 0xfc0   :  { %v793_v60 = vpop.permute.xlu1 %792 }
 0xfc1   :  { %v1732_v61 = vmul.f32 %v1445_v6, %v793_v60 }
 0xfc3   :  { %805 = vrot.lane.b32.xlu0 %v1732_v61, %s1505_s5 }
0x1035   :  { %v806_v62 = vpop.permute.xlu0 %805 }
0x1036   :  { %1360 = vmatmul.mubr.msk.f32.vlgmr.msra.gmra.mxu1 %vm153_vm3, %v806_v62 }
0x1037   :  { %1381 = vmatprep.mubr.msk.f32.mxu1 %vm1503_vm2, %v1502_v4 }
0x10f6   :  { %v875_v0 = vpop.f32.mrf.mxu1 }
0x10f7   :  { %v879_v1 = vadd.f32 %v875_v0, %v803_v63  ;;  %v1225_v63 = vld [vmem:[%s1845_s9] ss:$0 sm:$0xff] }
0x10f8   :  { %v1361_v2 = vpop.f32.mrf.mxu1 }
0x10f9   :  { %1448 = vtanh.f32 %v879_v1  ;;  %v1218_v10 = vmul.f32 -1.442695, %v879_v1 }
0x10fb   :  { %1450 = vpow2.f32 %v1218_v10 }
0x1106   :  { %v1449_v8 = vpop.eup %1448 }
0x1107   :  { %889 = vrot.lane.b32.xlu1 %v1449_v8, %s1504_s12 }
0x1108   :  { %v1451_v11 = vpop.eup %1450 }
0x1109   :  { %v883_v12 = vadd.f32 1.0, %v1451_v11 }
0x110b   :  { %1452 = vrcp.f32 %v883_v12 }
0x1118   :  { %v1453_v13 = vpop.eup %1452 }
0x1119   :  { %v887_v16 = vmul.f32 %v1453_v13, %v789_v58  ;;  %v47_v58 = vld [vmem:[%s1844_s8] sm:$0xff] }
0x1179   :  { %v890_v14 = vpop.permute.xlu1 %889 }
0x117a   :  { %v892_v15 = vmul.f32 %v1453_v13, %v890_v14 }
0x117c   :  { %894 = vrot.lane.b32.xlu0 %v892_v15, %s1505_s5 }
0x11ee   :  { %v895_v17 = vpop.permute.xlu0 %894 }
0x11ef   :  { %v897_v18 = vadd.f32 %v895_v17, %v887_v16 }
0x11f1   :  { %1454 = vtanh.f32 %v897_v18 }
0x11fe   :  { %v1455_v19 = vpop.eup %1454 }
0x11ff   :  { %900 = vrot.lane.b32.xlu1 %v1455_v19, %s1504_s12 }
0x1271   :  { %v901_v20 = vpop.permute.xlu1 %900 }
0x1272   :  { %v903_v21 = vmul.f32 %v1453_v13, %v901_v20 }
0x1274   :  { %913 = vrot.lane.b32.xlu0 %v903_v21, %s1505_s5 }
0x12e6   :  { %v914_v22 = vpop.permute.xlu0 %913 }
0x12e7   :  { %1371 = vmatmul.mubr.msk.f32.vlgmr.msra.gmra.mxu0 %vm153_vm3, %v914_v22 }
0x12e8   :  { %1392 = vmatprep.mubr.msk.f32.mxu0 %vm1503_vm2, %v1502_v4 }
0x13a7   :  { %v983_v24 = vpop.f32.mrf.mxu0 }
0x13a8   :  { %v987_v25 = vadd.f32 %v983_v24, %v911_v23 }
0x13a9   :  { %v1372_v26 = vpop.f32.mrf.mxu0 }
0x13aa   :  { %1456 = vtanh.f32 %v987_v25  ;;  %v1221_v29 = vmul.f32 -1.442695, %v987_v25 }
0x13ac   :  { %1458 = vpow2.f32 %v1221_v29 }
0x13b7   :  { %v1457_v28 = vpop.eup %1456 }
0x13b8   :  { %997 = vrot.lane.b32.xlu1 %v1457_v28, %s1504_s12 }
0x13b9   :  { %v1459_v30 = vpop.eup %1458 }
0x13ba   :  { %v991_v31 = vadd.f32 1.0, %v1459_v30 }
0x13bc   :  { %1460 = vrcp.f32 %v991_v31 }
0x13c9   :  { %v1461_v33 = vpop.eup %1460 }
0x13ca   :  { %v995_v36 = vmul.f32 %v1461_v33, %v897_v18 }
0x142a   :  { %v998_v34 = vpop.permute.xlu1 %997 }
0x142b   :  { %v1000_v35 = vmul.f32 %v1461_v33, %v998_v34 }
0x142d   :  { %1002 = vrot.lane.b32.xlu0 %v1000_v35, %s1505_s5 }
0x149f   :  { %v1003_v37 = vpop.permute.xlu0 %1002 }
0x14a0   :  { %v1005_v38 = vadd.f32 %v1003_v37, %v995_v36 }
0x14a2   :  { %1462 = vtanh.f32 %v1005_v38 }
0x14a3   :  { %1464 = vtanh.f32 %v1642_v32  ;;  %v45_v32 = vld [vmem:[%s1842_s6 + $0x18] sm:$0xff] }
0x14a4   :  { %1466 = vtanh.f32 %v1678_v9  ;;  %v44_v9 = vld [vmem:[%s1842_s6 + $0x10] sm:$0xff]  ;;  %1374 = vmatpush3.msra.mxu1 %v45_v32 }
0x14a5   :  { %1468 = vtanh.f32 %v1714_v46  ;;  %1375 = vmatprep.subr.mxu1 %v1502_v4 }
0x14a6   :  { %1470 = vtanh.f32 %v903_v21  ;;  %1376 = vmatpush3.msra.mxu1 %v44_v9 }
0x14a7   :  { %1377 = vmatprep.subr.mxu1 %v1502_v4 }
0x14a8   :  { %1378 = vmatpush3.msra.mxu1 %v43_v44 }
0x14a9   :  { %1379 = vmatprep.subr.mxu1 %v1502_v4 }
0x14aa   :  { %1380 = vmatpush3.msra.mxu1 %v42_v45 }
0x14af   :  { %v1463_v39 = vpop.eup %1462 }
0x14b0   :  { %1008 = vrot.lane.b32.xlu1 %v1463_v39, %s1504_s12  ;;  %v1465_v40 = vpop.eup %1464 }
0x14b1   :  { %v1467_v41 = vpop.eup %1466 }
0x14b2   :  { %v1469_v42 = vpop.eup %1468 }
0x14b3   :  { %v1471_v43 = vpop.eup %1470 }
0x14b4   :  { %258 = vrot.lane.b32.xlu1 %v1465_v40, %s1505_s5 }
0x14b8   :  { %474 = vrot.lane.b32.xlu1 %v1467_v41, %s1505_s5 }
0x14bc   :  { %690 = vrot.lane.b32.xlu1 %v1469_v42, %s1505_s5 }
0x14c0   :  { %906 = vrot.lane.b32.xlu1 %v1471_v43, %s1505_s5 }
0x1522   :  { %v1009_v46 = vpop.permute.xlu1 %1008 }
0x1523   :  { %v1011_v47 = vmul.f32 %v1461_v33, %v1009_v46 }
0x1525   :  { %1472 = vtanh.f32 %v1011_v47 }
0x1526   :  { %v259_v48 = vpop.permute.xlu1 %258  ;;  %1474 = vtanh.f32 %v1660_v50  ;;  %v50_v50 = vld [vmem:[%s1844_s8 + $0x18] sm:$0xff]  ;;  %s1480_s8 = scalar_lea.vmem %s1187_s24, 32 }
0x1527   :  { %262 = vst.msk [vmem:[%s1846_s10] sm:$0x3] %vm261_vm4, %v259_v48  ;;  %1476 = vtanh.f32 %v1696_v27  ;;  %1385 = vmatpush3.msra.mxu0 %v50_v50  ;;  %p1481_p0 = scmp.ne.s32.totalorder %s1187_s24, %s1480_s8  ;;  %p1486_p2 = scmp.lt.s32.totalorder %s1480_s8, %s1480_s8 }
0x1528   :  { %1478 = vtanh.f32 %v1732_v61  ;;  %1386 = vmatprep.subr.mxu0 %v1502_v4 }
0x1529   :  { %1387 = vmatpush3.msra.mxu0 %v49_v53  ;;  %p1487_p3 = por %p1486_p2, %p1485_p1 }
0x152a   :  { %v475_v49 = vpop.permute.xlu1 %474  ;;  %1388 = vmatprep.subr.mxu0 %v1502_v4 }
0x152b   :  { %1207 = vst.msk [vmem:[%s1846_s10 + $0x4] sm:$0x3] %vm261_vm4, %v475_v49  ;;  %1389 = vmatpush3.msra.mxu0 %v48_v57  ;;  %p1488_p4 = pnand %p1487_p3, %p1481_p0 }
0x152c   :  { %1390 = vmatprep.subr.mxu0 %v1502_v4 }
0x152d   :  { %1391 = vmatpush3.msra.mxu0 %v47_v58 }
0x152e   :  { %v691_v3 = vpop.permute.xlu1 %690 }
0x152f   :  { %1213 = vst.msk [vmem:[%s1846_s10 + $0x8] sm:$0x3] %vm261_vm4, %v691_v3 }
0x1532   :  { %v1473_v51 = vpop.eup %1472  ;;  %v907_v52 = vpop.permute.xlu1 %906 }
0x1533   :  { %1219 = vst.msk [vmem:[%s1846_s10 + $0xc] sm:$0x3] %vm261_vm4, %v907_v52  ;;  %1014 = vrot.lane.b32.xlu0 %v1473_v51, %s1505_s5  ;;  %v1475_v27 = vpop.eup %1474 }
0x1534   :  { %v1477_v5 = vpop.eup %1476 }
0x1535   :  { %v1479_v54 = vpop.eup %1478 }
0x1537   :  { %366 = vrot.lane.b32.xlu0 %v1475_v27, %s1505_s5 }
0x153b   :  { %582 = vrot.lane.b32.xlu0 %v1477_v5, %s1505_s5 }
0x153f   :  { %798 = vrot.lane.b32.xlu0 %v1479_v54, %s1505_s5 }
0x15a5   :  { %v1015_v6 = vpop.permute.xlu0 %1014 }
0x15a6   :  { %1222 = vst.msk [vmem:[%s1846_s10 + $0xe] sm:$0x3] %vm261_vm4, %v1015_v6  ;;  %1382 = vmatmul.mubr.msk.f32.vlgmr.msra.gmra.mxu1 %vm153_vm3, %v1015_v6 }
0x15a9   :  { %v367_v55 = vpop.permute.xlu0 %366 }
0x15aa   :  { %1204 = vst.msk [vmem:[%s1846_s10 + $0x2] sm:$0x3] %vm261_vm4, %v367_v55 }
0x15ad   :  { %v583_v56 = vpop.permute.xlu0 %582 }
0x15ae   :  { %1210 = vst.msk [vmem:[%s1846_s10 + $0x6] sm:$0x3] %vm261_vm4, %v583_v56 }
0x15b1   :  { %v799_v7 = vpop.permute.xlu0 %798 }
0x15b2   :  { %1216 = vst.msk [vmem:[%s1846_s10 + $0xa] sm:$0x3] %vm261_vm4, %v799_v7 }
0x1666   :  { %v1093_v60 = vpop.f32.mrf.mxu1 }
0x1667   :  { %v1094_v61 = vadd.f32 %v1223_v59, %v1093_v60 }
0x1668   :  { %v1383_v62 = vpop.f32.mrf.mxu1 }
0x1669   :  { %1393 = vmatmul.mubr.msk.f32.vlgmr.msra.gmra.mxu0 %vm153_vm3, %v1094_v61 }
0x1729   :  { %v1172_v4 = vpop.f32.mrf.mxu0 }
0x172a   :  { %v1173_v0 = vadd.f32 %v1225_v63, %v1172_v4 }
0x172b   :  { %v1394_v1 = vpop.f32.mrf.mxu0 }
0x172c   :  { %1177 = vst.msk [vmem:[#allocation3] sm:$0x3] %vm1176_vm5, %v1173_v0 }
0x172d   :  { %1491 = shalt.err (!%p1488_p4)
}
0x172e   :  { %1189 = dma.vmem_to_hbm [thread:$0]  %s1187_s24, 32, %s1847_s11, [#allocation4]  }
0x172f   :  { %1500 = dma.done.wait [#allocation4], 32  }
0x1730   :  { %1501 = vsyncadd [#allocation4], 4294967264 }
0x1731   :  { %1195 = vsyncpa [#allocation4], 1 }

</bundles_post_ra>
